<compile_context>
chip_gen: v5e
topology: v5e:2x2
jax: 0.10.0
libtpu: 0.0.40
codegen_flags: <defaults>
</compile_context>

<pallas_src>
import math

import jax
import jax.numpy as jnp
from jax.experimental import pallas as pl
from jax.experimental.pallas import tpu as pltpu

B, S, D, H, DFF = 2, 8, 32, 4, 64
DK = D // H
BS = B * S
EPS = 1e-6

# ---- row offsets inside the (128, D) "C" slab (all pieces share last dim D) ----
_WO0 = 0                     # Wo            rows [0, 32)
_W20 = D                     # W2            rows [32, 96)
_VEC0 = D + DFF              # bo,b2,ln1_a,ln1_b,ln2_a,ln2_b  rows [96, 102), pad to 104
_HM0 = _VEC0 + 8             # head mask     rows [104, 108), pad to 112
_AM0 = _HM0 + 8              # additive attn mask rows [112, 128)
_CROWS = _AM0 + BS           # 128


def _layer_norm(x, a, b):
    # torch: a * (x - mean) / (std + eps) + b, std unbiased (ddof=1)
    mean = jnp.mean(x, axis=-1, keepdims=True)
    var = jnp.sum((x - mean) ** 2, axis=-1, keepdims=True) / (x.shape[-1] - 1)
    inv = 1.0 / (jnp.sqrt(var) + EPS)          # exact, hoisted: one divide per row
    return a * (x - mean) * inv + b


def encoder_layer_kernel(x_ref, qkv_ref, ffn_ref, c_ref, out_ref):
    xf = x_ref[...].reshape(BS, D)             # (B*S, D) row-wise slab

    qkv_slab = qkv_ref[...]                    # (D+1, 3D): Wq|Wk|Wv with bias row
    w_qkv, b_qkv = qkv_slab[:D, :], qkv_slab[D:, :]

    ffn_slab = ffn_ref[...]                    # (D+1, DFF): W1 with bias row
    w1, b1 = ffn_slab[:D, :], ffn_slab[D:, :]

    c = c_ref[...]                             # (128, D)
    wo = c[_WO0:_WO0 + D, :]
    w2 = c[_W20:_W20 + DFF, :]
    bo = c[_VEC0 + 0:_VEC0 + 1, :]
    b2 = c[_VEC0 + 1:_VEC0 + 2, :]
    ln1_a = c[_VEC0 + 2:_VEC0 + 3, :]
    ln1_b = c[_VEC0 + 3:_VEC0 + 4, :]
    ln2_a = c[_VEC0 + 4:_VEC0 + 5, :]
    ln2_b = c[_VEC0 + 5:_VEC0 + 6, :]
    head_mask = c[_HM0:_HM0 + H, :]            # (H, D): row h is 1.0 on head h's DK cols
    add_mask = c[_AM0:_AM0 + BS, :BS]          # (BS, BS): 0 (attend) / -1e9 (blocked)

    # ---- sublayer 0: x + self_attn(LayerNorm(x)) ----
    nx = _layer_norm(xf, ln1_a, ln1_b)
    qkv = jnp.dot(nx, w_qkv, preferred_element_type=jnp.float32) + b_qkv   # (BS, 3D)
    q, k, v = qkv[:, :D], qkv[:, D:2 * D], qkv[:, 2 * D:]

    # All-head scores in ONE matmul: masking Q's columns per head makes the full-D
    # contraction equal the per-head DK contraction (other columns add exact zeros).
    qm = (q[None, :, :] * head_mask[:, None, :]).reshape(H * BS, D)        # (H*BS, D)
    scores = jnp.einsum('qd,kd->qk', qm, k,
                        preferred_element_type=jnp.float32) * (1.0 / math.sqrt(DK))
    scores = scores.reshape(H, BS, BS) + add_mask[None, :, :]
    scores = scores - jnp.max(scores, axis=-1, keepdims=True)
    e = jnp.exp(scores)
    p = e / jnp.sum(e, axis=-1, keepdims=True)       # exact softmax (no approx recip)

    # All-head context in ONE matmul; head merge = masked sum over the head axis.
    ctx = jnp.dot(p.reshape(H * BS, BS), v, preferred_element_type=jnp.float32)
    attn = jnp.sum(ctx.reshape(H, BS, D) * head_mask[:, None, :], axis=0)  # (BS, D)

    attn = jnp.dot(attn, wo, preferred_element_type=jnp.float32) + bo
    x1 = xf + attn                                   # dropout == identity (eval)

    # ---- sublayer 1: x1 + feed_forward(LayerNorm(x1)) ----
    nx2 = _layer_norm(x1, ln2_a, ln2_b)
    hdn = jnp.maximum(jnp.dot(nx2, w1, preferred_element_type=jnp.float32) + b1, 0.0)
    ffn = jnp.dot(hdn, w2, preferred_element_type=jnp.float32) + b2
    out_ref[...] = (x1 + ffn).reshape(B, S, D)


def encoder_layer(x, mask, params):
    (wq, bq, wk, bk, wv, bv, wo, bo, w1, b1, w2, b2, a1, g1, a2, g2) = params

    # -------- host-side packing: 16 params + mask -> 3 lane-matched slabs --------
    qkv_slab = jnp.concatenate(
        [jnp.concatenate([wq, wk, wv], axis=1),
         jnp.concatenate([bq, bk, bv], axis=1)], axis=0)             # (D+1, 3D)
    ffn_slab = jnp.concatenate([w1, b1], axis=0)                     # (D+1, DFF)

    # head selector: row h is 1.0 on columns [h*DK, (h+1)*DK)
    head_mask = jnp.repeat(jnp.eye(H, dtype=jnp.float32), DK, axis=1)  # (H, D)

    # additive attention mask over flattened (b, s) row/key axes:
    # 0 where key is in the same batch AND unmasked, -1e9 otherwise.
    rows = jnp.arange(BS)
    same_batch = (rows[:, None] // S) == (rows[None, :] // S)
    key_ok = (mask.reshape(BS) != 0.0)[None, :]
    add_mask = jnp.where(same_batch & key_ok, 0.0, -1e9).astype(jnp.float32)  # (BS, BS)
    # NOTE: BS <= D at this toy size, so the mask fits (padded) in the D-wide slab.
    add_mask = jnp.pad(add_mask, ((0, 0), (0, D - BS)))              # (BS, D)

    c_slab = jnp.concatenate(
        [wo, w2, bo, b2, a1, g1, a2, g2,
         jnp.zeros((2, D), jnp.float32),          # pad biases/LN block to 8 rows
         head_mask, jnp.zeros((4, D), jnp.float32),   # pad head mask block to 8 rows
         add_mask], axis=0)                                          # (_CROWS, D)

    in_specs = [
        pl.BlockSpec((B, S, D), lambda i: (0, 0, 0)),        # x
        pl.BlockSpec((D + 1, 3 * D), lambda i: (0, 0)),      # QKV weight + bias
        pl.BlockSpec((D + 1, DFF), lambda i: (0, 0)),        # FFN W1 + b1
        pl.BlockSpec((_CROWS, D), lambda i: (0, 0)),         # Wo|W2|biases|LN|masks
    ]

    return pl.pallas_call(
        encoder_layer_kernel,
        grid=(1,),   # single invocation: whole layer fused, no per-batch grid overhead
        in_specs=in_specs,
        out_specs=pl.BlockSpec((B, S, D), lambda i: (0, 0, 0)),
        out_shape=jax.ShapeDtypeStruct((B, S, D), jnp.float32),
        compiler_params=pltpu.CompilerParams(dimension_semantics=("arbitrary",)),
    )(x, qkv_slab, ffn_slab, c_slab)


def reference(x, mask, params):
    (wq, bq, wk, bk, wv, bv, wo, bo, w1, b1, w2, b2, a1, g1, a2, g2) = params

    def ln(z, a, b):
        mean = z.mean(-1, keepdims=True)
        var = jnp.sum((z - mean) ** 2, -1, keepdims=True) / (z.shape[-1] - 1)
        return a * (z - mean) / (jnp.sqrt(var) + EPS) + b

    nx = ln(x, a1, g1)
    q = nx @ wq + bq
    k = nx @ wk + bk
    v = nx @ wv + bv
    qh = q.reshape(B, S, H, DK).transpose(0, 2, 1, 3)
    kh = k.reshape(B, S, H, DK).transpose(0, 2, 1, 3)
    vh = v.reshape(B, S, H, DK).transpose(0, 2, 1, 3)
    sc = jnp.einsum("bhqd,bhkd->bhqk", qh, kh) / math.sqrt(DK)
    sc = jnp.where(mask[:, None, :, :] == 0.0, -1e9, sc)
    p = jax.nn.softmax(sc, axis=-1)
    att = jnp.einsum("bhqk,bhkd->bhqd", p, vh).transpose(0, 2, 1, 3).reshape(B, S, D)
    x1 = x + (att @ wo + bo)
    nx2 = ln(x1, a2, g2)
    ffn = jnp.maximum(nx2 @ w1 + b1, 0.0) @ w2 + b2
    return x1 + ffn


if __name__ == "__main__":
    key = jax.random.PRNGKey(0)
    ks = jax.random.split(key, 16)

    def lin(kw, kb, din, dout):
        w = jax.random.normal(kw, (din, dout), jnp.float32) * 0.05
        b = jax.random.normal(kb, (1, dout), jnp.float32) * 0.05
        return w, b

    wq, bq = lin(ks[0], ks[1], D, D)
    wk, bk = lin(ks[2], ks[3], D, D)
    wv, bv = lin(ks[4], ks[5], D, D)
    wo, bo = lin(ks[6], ks[7], D, D)
    w1, b1 = lin(ks[8], ks[9], D, DFF)
    w2, b2 = lin(ks[10], ks[11], DFF, D)
    ln1_a = jnp.ones((1, D), jnp.float32)
    ln1_b = jnp.zeros((1, D), jnp.float32)
    ln2_a = jnp.ones((1, D), jnp.float32)
    ln2_b = jnp.zeros((1, D), jnp.float32)

    params = [wq, bq, wk, bk, wv, bv, wo, bo,
              w1, b1, w2, b2,
              ln1_a, ln1_b, ln2_a, ln2_b]

    x = jax.random.normal(ks[12], (B, S, D), jnp.float32)
    mask = jnp.ones((B, 1, S), jnp.float32)
    mask = mask.at[:, :, -2:].set(0.0)   # mask the last two key positions

    out = encoder_layer(x, mask, params)
    out = jax.block_until_ready(out)

    ref = reference(x, mask, params)
    assert out.shape == (B, S, D)
    err = float(jnp.max(jnp.abs(out - ref)))
    assert jnp.allclose(out, ref, atol=1e-4, rtol=1e-4), err
    print("KERNEL_OK")
</pallas_src>

<mosaic_0001>
module attributes {stable_mosaic.version = 11 : i64} {
  func.func @encoder_layer_kernel(%arg0: i32, %arg1: memref<2x8x32xf32, #tpu.memory_space<vmem>>, %arg2: memref<33x96xf32, #tpu.memory_space<vmem>>, %arg3: memref<33x64xf32, #tpu.memory_space<vmem>>, %arg4: memref<128x32xf32, #tpu.memory_space<vmem>>, %arg5: memref<2x8x32xf32, #tpu.memory_space<vmem>>) attributes {dimension_semantics = [#tpu.dimension_semantics<arbitrary>], iteration_bounds = array<i64: 1>, scalar_prefetch = 0 : i64, scratch_operands = 0 : i64, tpu.core_type = #tpu.core_type<tc>, window_params = [{pipeline_mode = #tpu.pipeline_mode<synchronous>, transform_indices = @transform_0, window_bounds = array<i64: 2, 8, 32>}, {pipeline_mode = #tpu.pipeline_mode<synchronous>, transform_indices = @transform_1, window_bounds = array<i64: 33, 96>}, {pipeline_mode = #tpu.pipeline_mode<synchronous>, transform_indices = @transform_2, window_bounds = array<i64: 33, 64>}, {pipeline_mode = #tpu.pipeline_mode<synchronous>, transform_indices = @transform_3, window_bounds = array<i64: 128, 32>}, {pipeline_mode = #tpu.pipeline_mode<synchronous>, transform_indices = @transform_4, window_bounds = array<i64: 2, 8, 32>}]} {
    %c0 = arith.constant 0 : index
    %c0_0 = arith.constant 0 : index
    %c0_1 = arith.constant 0 : index
    %0 = vector.load %arg1[%c0, %c0_0, %c0_1] : memref<2x8x32xf32, #tpu.memory_space<vmem>>, vector<2x8x32xf32>
    %1 = vector.shape_cast %0 : vector<2x8x32xf32> to vector<16x32xf32>
    %c0_2 = arith.constant 0 : index
    %c0_3 = arith.constant 0 : index
    %2 = vector.load %arg2[%c0_2, %c0_3] : memref<33x96xf32, #tpu.memory_space<vmem>>, vector<33x96xf32>
    %3 = vector.extract_strided_slice %2 {offsets = [0, 0], sizes = [32, 96], strides = [1, 1]} : vector<33x96xf32> to vector<32x96xf32>
    %4 = vector.extract_strided_slice %2 {offsets = [32, 0], sizes = [1, 96], strides = [1, 1]} : vector<33x96xf32> to vector<1x96xf32>
    %c0_4 = arith.constant 0 : index
    %c0_5 = arith.constant 0 : index
    %5 = vector.load %arg3[%c0_4, %c0_5] : memref<33x64xf32, #tpu.memory_space<vmem>>, vector<33x64xf32>
    %6 = vector.extract_strided_slice %5 {offsets = [0, 0], sizes = [32, 64], strides = [1, 1]} : vector<33x64xf32> to vector<32x64xf32>
    %7 = vector.extract_strided_slice %5 {offsets = [32, 0], sizes = [1, 64], strides = [1, 1]} : vector<33x64xf32> to vector<1x64xf32>
    %c0_6 = arith.constant 0 : index
    %c0_7 = arith.constant 0 : index
    %8 = vector.load %arg4[%c0_6, %c0_7] : memref<128x32xf32, #tpu.memory_space<vmem>>, vector<128x32xf32>
    %9 = vector.extract_strided_slice %8 {offsets = [0, 0], sizes = [32, 32], strides = [1, 1]} : vector<128x32xf32> to vector<32x32xf32>
    %10 = vector.extract_strided_slice %8 {offsets = [32, 0], sizes = [64, 32], strides = [1, 1]} : vector<128x32xf32> to vector<64x32xf32>
    %11 = vector.extract_strided_slice %8 {offsets = [96, 0], sizes = [1, 32], strides = [1, 1]} : vector<128x32xf32> to vector<1x32xf32>
    %12 = vector.extract_strided_slice %8 {offsets = [97, 0], sizes = [1, 32], strides = [1, 1]} : vector<128x32xf32> to vector<1x32xf32>
    %13 = vector.extract_strided_slice %8 {offsets = [98, 0], sizes = [1, 32], strides = [1, 1]} : vector<128x32xf32> to vector<1x32xf32>
    %14 = vector.extract_strided_slice %8 {offsets = [99, 0], sizes = [1, 32], strides = [1, 1]} : vector<128x32xf32> to vector<1x32xf32>
    %15 = vector.extract_strided_slice %8 {offsets = [100, 0], sizes = [1, 32], strides = [1, 1]} : vector<128x32xf32> to vector<1x32xf32>
    %16 = vector.extract_strided_slice %8 {offsets = [101, 0], sizes = [1, 32], strides = [1, 1]} : vector<128x32xf32> to vector<1x32xf32>
    %17 = vector.extract_strided_slice %8 {offsets = [104, 0], sizes = [4, 32], strides = [1, 1]} : vector<128x32xf32> to vector<4x32xf32>
    %18 = vector.extract_strided_slice %8 {offsets = [112, 0], sizes = [16, 16], strides = [1, 1]} : vector<128x32xf32> to vector<16x16xf32>
    %cst = arith.constant dense<0.000000e+00> : vector<16xf32>
    %19 = vector.multi_reduction <add>, %1, %cst [1] : vector<16x32xf32> to vector<16xf32>
    %20 = vector.shape_cast %19 : vector<16xf32> to vector<16x1xf32>
    %cst_8 = arith.constant 3.200000e+01 : f32
    %21 = vector.broadcast %cst_8 : f32 to vector<16x1xf32>
    %22 = arith.divf %20, %21 : vector<16x1xf32>
    %23 = vector.broadcast %22 : vector<16x1xf32> to vector<16x32xf32>
    %24 = arith.subf %1, %23 : vector<16x32xf32>
    %25 = arith.mulf %24, %24 : vector<16x32xf32>
    %cst_9 = arith.constant dense<0.000000e+00> : vector<16xf32>
    %26 = vector.multi_reduction <add>, %25, %cst_9 [1] : vector<16x32xf32> to vector<16xf32>
    %27 = vector.shape_cast %26 : vector<16xf32> to vector<16x1xf32>
    %cst_10 = arith.constant 3.100000e+01 : f32
    %28 = vector.broadcast %cst_10 : f32 to vector<16x1xf32>
    %29 = arith.divf %27, %28 : vector<16x1xf32>
    %30 = math.sqrt %29 : vector<16x1xf32>
    %cst_11 = arith.constant 9.99999997E-7 : f32
    %31 = vector.broadcast %cst_11 : f32 to vector<16x1xf32>
    %32 = arith.addf %30, %31 : vector<16x1xf32>
    %cst_12 = arith.constant 1.000000e+00 : f32
    %33 = vector.broadcast %cst_12 : f32 to vector<16x1xf32>
    %34 = arith.divf %33, %32 : vector<16x1xf32>
    %35 = vector.broadcast %22 : vector<16x1xf32> to vector<16x32xf32>
    %36 = arith.subf %1, %35 : vector<16x32xf32>
    %37 = vector.broadcast %13 : vector<1x32xf32> to vector<16x32xf32>
    %38 = arith.mulf %37, %36 : vector<16x32xf32>
    %39 = vector.broadcast %34 : vector<16x1xf32> to vector<16x32xf32>
    %40 = arith.mulf %38, %39 : vector<16x32xf32>
    %41 = vector.broadcast %14 : vector<1x32xf32> to vector<16x32xf32>
    %42 = arith.addf %40, %41 : vector<16x32xf32>
    %cst_13 = arith.constant dense<0.000000e+00> : vector<16x96xf32>
    %43 = tpu.matmul %42, %3, %cst_13 {dimension_numbers = #tpu.dot_dimension_numbers<[1], [0], [0], [1], [0, 0, 1, 1], [], []>} : vector<16x32xf32>, vector<32x96xf32>, vector<16x96xf32> -> vector<16x96xf32>
    %44 = vector.broadcast %4 : vector<1x96xf32> to vector<16x96xf32>
    %45 = arith.addf %43, %44 : vector<16x96xf32>
    %46 = vector.extract_strided_slice %45 {offsets = [0, 0], sizes = [16, 32], strides = [1, 1]} : vector<16x96xf32> to vector<16x32xf32>
    %47 = vector.extract_strided_slice %45 {offsets = [0, 32], sizes = [16, 32], strides = [1, 1]} : vector<16x96xf32> to vector<16x32xf32>
    %48 = vector.extract_strided_slice %45 {offsets = [0, 64], sizes = [16, 32], strides = [1, 1]} : vector<16x96xf32> to vector<16x32xf32>
    %49 = vector.shape_cast %46 : vector<16x32xf32> to vector<1x16x32xf32>
    %50 = vector.shape_cast %17 : vector<4x32xf32> to vector<4x1x32xf32>
    %51 = vector.broadcast %49 : vector<1x16x32xf32> to vector<4x16x32xf32>
    %52 = vector.broadcast %50 : vector<4x1x32xf32> to vector<4x16x32xf32>
    %53 = arith.mulf %51, %52 : vector<4x16x32xf32>
    %54 = vector.shape_cast %53 : vector<4x16x32xf32> to vector<64x32xf32>
    "tpu.trace_start"() <{level = 10 : i32, message = "qd,kd->qk"}> : () -> ()
    %cst_14 = arith.constant dense<0.000000e+00> : vector<64x16xf32>
    %55 = tpu.matmul %54, %47, %cst_14 {dimension_numbers = #tpu.dot_dimension_numbers<[1], [1], [0], [0], [0, 0, 1, 0], [], []>} : vector<64x32xf32>, vector<16x32xf32>, vector<64x16xf32> -> vector<64x16xf32>
    "tpu.trace_stop"() : () -> ()
    %cst_15 = arith.constant 0.353553385 : f32
    %56 = vector.broadcast %cst_15 : f32 to vector<64x16xf32>
    %57 = arith.mulf %55, %56 : vector<64x16xf32>
    %58 = vector.shape_cast %57 : vector<64x16xf32> to vector<4x16x16xf32>
    %59 = vector.shape_cast %18 : vector<16x16xf32> to vector<1x16x16xf32>
    %60 = vector.broadcast %59 : vector<1x16x16xf32> to vector<4x16x16xf32>
    %61 = arith.addf %58, %60 : vector<4x16x16xf32>
    %cst_16 = arith.constant dense<0xFF800000> : vector<4x16xf32>
    %62 = vector.multi_reduction <maximumf>, %61, %cst_16 [2] : vector<4x16x16xf32> to vector<4x16xf32>
    %63 = vector.shape_cast %62 : vector<4x16xf32> to vector<4x16x1xf32>
    %64 = vector.broadcast %63 : vector<4x16x1xf32> to vector<4x16x16xf32>
    %65 = arith.subf %61, %64 : vector<4x16x16xf32>
    %66 = math.exp %65 : vector<4x16x16xf32>
    %cst_17 = arith.constant dense<0.000000e+00> : vector<4x16xf32>
    %67 = vector.multi_reduction <add>, %66, %cst_17 [2] : vector<4x16x16xf32> to vector<4x16xf32>
    %68 = vector.shape_cast %67 : vector<4x16xf32> to vector<4x16x1xf32>
    %69 = vector.broadcast %68 : vector<4x16x1xf32> to vector<4x16x16xf32>
    %70 = arith.divf %66, %69 : vector<4x16x16xf32>
    %71 = vector.shape_cast %70 : vector<4x16x16xf32> to vector<64x16xf32>
    %cst_18 = arith.constant dense<0.000000e+00> : vector<64x32xf32>
    %72 = tpu.matmul %71, %48, %cst_18 {dimension_numbers = #tpu.dot_dimension_numbers<[1], [0], [0], [1], [0, 0, 1, 1], [], []>} : vector<64x16xf32>, vector<16x32xf32>, vector<64x32xf32> -> vector<64x32xf32>
    %73 = vector.shape_cast %72 : vector<64x32xf32> to vector<4x16x32xf32>
    %74 = vector.shape_cast %17 : vector<4x32xf32> to vector<4x1x32xf32>
    %75 = vector.broadcast %74 : vector<4x1x32xf32> to vector<4x16x32xf32>
    %76 = arith.mulf %73, %75 : vector<4x16x32xf32>
    %cst_19 = arith.constant dense<0.000000e+00> : vector<16x32xf32>
    %77 = vector.multi_reduction <add>, %76, %cst_19 [0] : vector<4x16x32xf32> to vector<16x32xf32>
    %cst_20 = arith.constant dense<0.000000e+00> : vector<16x32xf32>
    %78 = tpu.matmul %77, %9, %cst_20 {dimension_numbers = #tpu.dot_dimension_numbers<[1], [0], [0], [1], [0, 0, 1, 1], [], []>} : vector<16x32xf32>, vector<32x32xf32>, vector<16x32xf32> -> vector<16x32xf32>
    %79 = vector.broadcast %11 : vector<1x32xf32> to vector<16x32xf32>
    %80 = arith.addf %78, %79 : vector<16x32xf32>
    %81 = arith.addf %1, %80 : vector<16x32xf32>
    %cst_21 = arith.constant dense<0.000000e+00> : vector<16xf32>
    %82 = vector.multi_reduction <add>, %81, %cst_21 [1] : vector<16x32xf32> to vector<16xf32>
    %83 = vector.shape_cast %82 : vector<16xf32> to vector<16x1xf32>
    %cst_22 = arith.constant 3.200000e+01 : f32
    %84 = vector.broadcast %cst_22 : f32 to vector<16x1xf32>
    %85 = arith.divf %83, %84 : vector<16x1xf32>
    %86 = vector.broadcast %85 : vector<16x1xf32> to vector<16x32xf32>
    %87 = arith.subf %81, %86 : vector<16x32xf32>
    %88 = arith.mulf %87, %87 : vector<16x32xf32>
    %cst_23 = arith.constant dense<0.000000e+00> : vector<16xf32>
    %89 = vector.multi_reduction <add>, %88, %cst_23 [1] : vector<16x32xf32> to vector<16xf32>
    %90 = vector.shape_cast %89 : vector<16xf32> to vector<16x1xf32>
    %cst_24 = arith.constant 3.100000e+01 : f32
    %91 = vector.broadcast %cst_24 : f32 to vector<16x1xf32>
    %92 = arith.divf %90, %91 : vector<16x1xf32>
    %93 = math.sqrt %92 : vector<16x1xf32>
    %cst_25 = arith.constant 9.99999997E-7 : f32
    %94 = vector.broadcast %cst_25 : f32 to vector<16x1xf32>
    %95 = arith.addf %93, %94 : vector<16x1xf32>
    %cst_26 = arith.constant 1.000000e+00 : f32
    %96 = vector.broadcast %cst_26 : f32 to vector<16x1xf32>
    %97 = arith.divf %96, %95 : vector<16x1xf32>
    %98 = vector.broadcast %85 : vector<16x1xf32> to vector<16x32xf32>
    %99 = arith.subf %81, %98 : vector<16x32xf32>
    %100 = vector.broadcast %15 : vector<1x32xf32> to vector<16x32xf32>
    %101 = arith.mulf %100, %99 : vector<16x32xf32>
    %102 = vector.broadcast %97 : vector<16x1xf32> to vector<16x32xf32>
    %103 = arith.mulf %101, %102 : vector<16x32xf32>
    %104 = vector.broadcast %16 : vector<1x32xf32> to vector<16x32xf32>
    %105 = arith.addf %103, %104 : vector<16x32xf32>
    %cst_27 = arith.constant dense<0.000000e+00> : vector<16x64xf32>
    %106 = tpu.matmul %105, %6, %cst_27 {dimension_numbers = #tpu.dot_dimension_numbers<[1], [0], [0], [1], [0, 0, 1, 1], [], []>} : vector<16x32xf32>, vector<32x64xf32>, vector<16x64xf32> -> vector<16x64xf32>
    %107 = vector.broadcast %7 : vector<1x64xf32> to vector<16x64xf32>
    %108 = arith.addf %106, %107 : vector<16x64xf32>
    %cst_28 = arith.constant 0.000000e+00 : f32
    %109 = vector.broadcast %cst_28 : f32 to vector<16x64xf32>
    %110 = arith.maximumf %108, %109 : vector<16x64xf32>
    %cst_29 = arith.constant dense<0.000000e+00> : vector<16x32xf32>
    %111 = tpu.matmul %110, %10, %cst_29 {dimension_numbers = #tpu.dot_dimension_numbers<[1], [0], [0], [1], [0, 0, 1, 1], [], []>} : vector<16x64xf32>, vector<64x32xf32>, vector<16x32xf32> -> vector<16x32xf32>
    %112 = vector.broadcast %12 : vector<1x32xf32> to vector<16x32xf32>
    %113 = arith.addf %111, %112 : vector<16x32xf32>
    %114 = arith.addf %81, %113 : vector<16x32xf32>
    %115 = vector.shape_cast %114 : vector<16x32xf32> to vector<2x8x32xf32>
    %c0_30 = arith.constant 0 : index
    %c0_31 = arith.constant 0 : index
    %c0_32 = arith.constant 0 : index
    %116 = vector.load %arg5[%c0_30, %c0_31, %c0_32] : memref<2x8x32xf32, #tpu.memory_space<vmem>>, vector<2x8x32xf32>
    tpu.vector_store %arg5[%c0_30, %c0_31, %c0_32], %115 {strides = array<i32>} : memref<2x8x32xf32, #tpu.memory_space<vmem>>, vector<2x8x32xf32>,
    return
  }
  func.func @transform_0(%arg0: i32) -> (i32, i32, i32) {
    %c0_i32 = arith.constant 0 : i32
    %c0_i32_0 = arith.constant 0 : i32
    %c0_i32_1 = arith.constant 0 : i32
    %c0_i32_2 = arith.constant 0 : i32
    return %c0_i32, %c0_i32_0, %c0_i32_1 : i32, i32, i32
  }
  func.func @transform_1(%arg0: i32) -> (i32, i32) {
    %c0_i32 = arith.constant 0 : i32
    %c0_i32_0 = arith.constant 0 : i32
    %c0_i32_1 = arith.constant 0 : i32
    return %c0_i32, %c0_i32_0 : i32, i32
  }
  func.func @transform_2(%arg0: i32) -> (i32, i32) {
    %c0_i32 = arith.constant 0 : i32
    %c0_i32_0 = arith.constant 0 : i32
    %c0_i32_1 = arith.constant 0 : i32
    return %c0_i32, %c0_i32_0 : i32, i32
  }
  func.func @transform_3(%arg0: i32) -> (i32, i32) {
    %c0_i32 = arith.constant 0 : i32
    %c0_i32_0 = arith.constant 0 : i32
    %c0_i32_1 = arith.constant 0 : i32
    return %c0_i32, %c0_i32_0 : i32, i32
  }
  func.func @transform_4(%arg0: i32) -> (i32, i32, i32) {
    %c0_i32 = arith.constant 0 : i32
    %c0_i32_0 = arith.constant 0 : i32
    %c0_i32_1 = arith.constant 0 : i32
    %c0_i32_2 = arith.constant 0 : i32
    return %c0_i32, %c0_i32_0, %c0_i32_1 : i32, i32, i32
  }
}

</mosaic_0001>

<bundles_post_ra>
// kernel: tpu_custom_call.1
= control target key start
LH: loop header
LB: loop body
LE: loop exit
PB: predicated region body
PF: predicated region fallthrough
CT: control target
= control target key end

     0   :  { %vm46_vm0 = vcmask 261120   ;;  %s1267_s0 = inlined_call_operand.vmem [shape: f32[2,8,32], index: 0, kind: input, shape index: {}]   ;;  %s1268_s1 = inlined_call_operand.vmem [shape: f32[33,96], index: 1, kind: input, shape index: {}]   ;;  %s1269_s2 = inlined_call_operand.vmem [shape: f32[33,64], index: 2, kind: input, shape index: {}]   ;;  %s1270_s3 = inlined_call_operand.vmem [shape: f32[128,32], index: 3, kind: input, shape index: {}]   ;;  %s1271_s4 = inlined_call_operand.hbm [shape: f32[2,8,32], index: 4, kind: output, shape index: {}]  }
   0x1   :  { %v930_v0 = vld [vmem:[%s1267_s0] sm:$0xff] }
   0x2   :  { %v47_v1 = vsel %vm46_vm0, %v930_v0, 0.0 }
   0x3   :  { %48 = vadd.xlane.f32.xlu0 %v47_v1 }
   0x4   :  { %9 = vsyncpa [#allocation3], 0  ;;  %v937_v2 = vld [vmem:[%s1267_s0 + $0x8] sm:$0xff]  ;;  %v895_v4 = vmov 32.0   ;;  %v896_v21 = vmov 31.0   ;;  %v23_v27 = vld [vmem:[%s1268_s1 + $0x18] sm:$0xff] }
   0x5   :  { %v50_v3 = vsel %vm46_vm0, %v937_v2, 0.0  ;;  %817 = vrcp.f32 %v895_v4  ;;  %v22_v28 = vld [vmem:[%s1268_s1 + $0x10] sm:$0xff]  ;;  %164 = vmatpush.msra.mxu0 %v23_v27  ;;  %v21_v30 = vld [vmem:[%s1268_s1 + $0x8] sm:$0xff]  ;;  %v20_v32 = vld [vmem:[%s1268_s1] sm:$0xff]  ;;  %s897_s30 = smov 96   ;;  %vm286_vm15 = vcmask 130048  }
   0x6   :  { %819 = vrcp.f32 %v896_v21  ;;  %v976_v59 = vld [vmem:[%s1270_s3 + $0x60] sm:$0xff]  ;;  %s898_s10 = smov 64   ;;  %s761_s0 = sshll.u32 %s1271_s4, 4  ;;  %s762_s0 = int_to_ptr.hbm [resolvable:$true] %s761_s0 }
   0x7   :  { %165 = vmatpush.msra.mxu0 %v22_v28  ;;  %v137_v62 = vperm.slane %v976_v59, 2  ;;  %v815_v28 = vld [vmem:[%s1268_s1 + $0x20] ss:$0 sm:$0xff]  ;;  %s900_s19 = smov 128   ;;  %s901_s20 = smov 8  }
   0x9   :  { %166 = vmatpush.msra.mxu0 %v21_v30 }
   0xb   :  { %51 = vadd.xlane.f32.xlu0 %v50_v3  ;;  %v818_v5 = vpop.eup %817  ;;  %167 = vmatpush.msra.mxu0 %v20_v32 }
   0xc   :  { %v54_v6 = vmul.f32 32.0, %v818_v5  ;;  %vm58_vm1 = vweird.f32 %v818_v5  ;;  %v820_v22 = vpop.eup %819 }
   0xd   :  { %v73_v23 = vmul.f32 31.0, %v820_v22  ;;  %vm77_vm2 = vweird.f32 %v820_v22 }
   0xe   :  { %v55_v7 = vsub.f32 1.0, %v54_v6 }
   0xf   :  { %v74_v24 = vsub.f32 1.0, %v73_v23 }
  0x10   :  { %v56_v8 = vmul.f32 %v818_v5, %v55_v7 }
  0x11   :  { %v75_v25 = vmul.f32 %v820_v22, %v74_v24 }
  0x12   :  { %v57_v9 = vadd.f32 %v818_v5, %v56_v8 }
  0x13   :  { %v76_v26 = vadd.f32 %v820_v22, %v75_v25 }
  0x14   :  { %v941_v10 = vsel %vm58_vm1, %v818_v5, %v57_v9  ;;  %v142_v9 = vperm.slane %v976_v59, 3 }
  0x15   :  { %v963_v29 = vsel %vm77_vm2, %v820_v22, %v76_v26 }
  0x76   :  { %v49_v11 = vpop.xlane.xlu0 %48 }
  0x77   :  { %v60_v12 = vmul.f32 %v941_v10, %v49_v11 }
  0x79   :  { %v945_v13 = vsub.f32 %v930_v0, %v60_v12 }
  0x7b   :  { %v64_v14 = vmul.f32 %v945_v13, %v945_v13  ;;  %v138_v6 = vmul.f32 %v137_v62, %v945_v13 }
  0x7d   :  { %v66_v15 = vsel %vm46_vm0, %v64_v14, 0.0 }
  0x7e   :  { %67 = vadd.xlane.f32.xlu1 %v66_v15  ;;  %v52_v16 = vpop.xlane.xlu0 %51 }
  0x7f   :  { %v61_v17 = vmul.f32 %v941_v10, %v52_v16 }
  0x81   :  { %v952_v18 = vsub.f32 %v937_v2, %v61_v17 }
  0x83   :  { %v65_v19 = vmul.f32 %v952_v18, %v952_v18  ;;  %v139_v22 = vmul.f32 %v137_v62, %v952_v18 }
  0x85   :  { %v69_v20 = vsel %vm46_vm0, %v65_v19, 0.0 }
  0x86   :  { %70 = vadd.xlane.f32.xlu1 %v69_v20 }
  0xf1   :  { %v68_v31 = vpop.xlane.xlu1 %67 }
  0xf2   :  { %v79_v33 = vmul.f32 %v963_v29, %v68_v31 }
  0xf4   :  { %821 = vrsqrt.f32 %v79_v33  ;;  %vm88_vm3 = vcmp.eq.f32.partialorder %v79_v33, inf  ;;  %v91_v46 = vand.u32 2147483648, %v79_v33  ;;  %vm90_vm4 = vcmp.eq.f32.partialorder %v79_v33, 0.0 }
  0xf9   :  { %v71_v34 = vpop.xlane.xlu1 %70 }
  0xfa   :  { %v822_v35 = vpop.eup %821  ;;  %v80_v36 = vmul.f32 %v963_v29, %v71_v34 }
  0xfb   :  { %v82_v37 = vmul.f32 %v822_v35, %v79_v33 }
  0xfc   :  { %823 = vrsqrt.f32 %v80_v36  ;;  %vm100_vm5 = vcmp.eq.f32.partialorder %v80_v36, inf  ;;  %v103_v54 = vand.u32 2147483648, %v80_v36  ;;  %vm102_vm6 = vcmp.eq.f32.partialorder %v80_v36, 0.0 }
  0xfd   :  { %v83_v38 = vmul.f32 %v822_v35, %v82_v37 }
  0xff   :  { %v84_v39 = vmul.f32 0.5, %v83_v38 }
 0x101   :  { %v85_v40 = vsub.f32 1.5, %v84_v39 }
 0x102   :  { %v824_v41 = vpop.eup %823 }
 0x103   :  { %v86_v42 = vmul.f32 %v822_v35, %v85_v40  ;;  %v94_v43 = vmul.f32 %v824_v41, %v80_v36 }
 0x105   :  { %v87_v44 = vmul.f32 %v86_v42, %v79_v33  ;;  %v95_v45 = vmul.f32 %v824_v41, %v94_v43 }
 0x107   :  { %v96_v47 = vmul.f32 0.5, %v95_v45  ;;  %v89_v48 = vsel %vm88_vm3, %v79_v33, %v87_v44  ;;  %v43_v33 = vld [vmem:[%s1270_s3 + $0x68] sm:$0xff] }
 0x108   :  { %v92_v49 = vsel %vm90_vm4, %v91_v46, %v89_v48  ;;  %v176_v35 = vrot.slane %v43_v33, 1  ;;  %v177_v43 = vrot.slane %v43_v33, 2 }
 0x109   :  { %v97_v50 = vsub.f32 1.5, %v96_v47  ;;  %v105_v51 = vadd.f32 1e-06, %v92_v49  ;;  %v178_v47 = vrot.slane %v43_v33, 3 }
 0x10a   :  { %v1002_v37 = vperm.slane %v176_v35, 0  ;;  %v1018_v44 = vperm.slane %v177_v43, 0 }
 0x10b   :  { %v98_v52 = vmul.f32 %v824_v41, %v97_v50  ;;  %825 = vrcp.f32 %v105_v51  ;;  %v118_v63 = vand.u32 2147483648, %v105_v51  ;;  %v116_v3 = vand.u32 2147483647, %v105_v51 }
 0x10c   :  { %vm112_vm8 = vweird.f32 %v105_v51  ;;  %v1026_v48 = vperm.slane %v178_v47, 0 }
 0x10d   :  { %v99_v53 = vmul.f32 %v98_v52, %v80_v36  ;;  %v119_v7 = vor.u32 1.1754944e-38, %v118_v63  ;;  %vm117_vm10 = vcmp.eq.f32.partialorder %v116_v3, 8.507059e+37  ;;  %v45_v63 = vld [vmem:[%s1270_s3 + $0x78] sm:$0xff] }
 0x10f   :  { %v101_v55 = vsel %vm100_vm5, %v80_v36, %v99_v53  ;;  %v1000_v36 = vperm.slane %v43_v33, 0  ;;  %v44_v53 = vld [vmem:[%s1270_s3 + $0x70] sm:$0xff] }
 0x110   :  { %v104_v56 = vsel %vm102_vm6, %v103_v54, %v101_v55 }
 0x111   :  { %v826_v57 = vpop.eup %825  ;;  %v106_v58 = vadd.f32 1e-06, %v104_v56 }
 0x112   :  { %v108_v60 = vmul.f32 %v826_v57, %v105_v51  ;;  %vm113_vm7 = vweird.f32 %v826_v57 }
 0x113   :  { %827 = vrcp.f32 %v106_v58  ;;  %vm114_vm9 = vmor %vm112_vm8, %vm113_vm7  ;;  %v133_v16 = vand.u32 2147483648, %v106_v58  ;;  %v131_v20 = vand.u32 2147483647, %v106_v58  ;;  %vm127_vm12 = vweird.f32 %v106_v58 }
 0x114   :  { %v109_v61 = vsub.f32 1.0, %v108_v60 }
 0x115   :  { %v134_v13 = vor.u32 1.1754944e-38, %v133_v16  ;;  %vm132_vm14 = vcmp.eq.f32.partialorder %v131_v20, 8.507059e+37 }
 0x116   :  { %v110_v1 = vmul.f32 %v826_v57, %v109_v61 }
 0x118   :  { %v111_v4 = vadd.f32 %v826_v57, %v110_v1 }
 0x119   :  { %v828_v5 = vpop.eup %827 }
 0x11a   :  { %v115_v8 = vsel %vm114_vm9, %v826_v57, %v111_v4  ;;  %v123_v11 = vmul.f32 %v828_v5, %v106_v58  ;;  %vm128_vm11 = vweird.f32 %v828_v5 }
 0x11b   :  { %v120_v12 = vsel %vm117_vm10, %v119_v7, %v115_v8  ;;  %vm129_vm13 = vmor %vm127_vm12, %vm128_vm11 }
 0x11c   :  { %v140_v14 = vmul.f32 %v138_v6, %v120_v12  ;;  %v124_v15 = vsub.f32 1.0, %v123_v11 }
 0x11e   :  { %v143_v17 = vadd.f32 %v142_v9, %v140_v14  ;;  %v125_v19 = vmul.f32 %v828_v5, %v124_v15 }
 0x120   :  { %773 = vmatmul.msk.f32.vlgmr.msra.gmra.mxu0 %vm46_vm0, %v143_v17  ;;  %v126_v21 = vadd.f32 %v828_v5, %v125_v19 }
 0x122   :  { %v130_v23 = vsel %vm129_vm13, %v828_v5, %v126_v21 }
 0x123   :  { %v135_v24 = vsel %vm132_vm14, %v134_v13, %v130_v23 }
 0x124   :  { %v141_v25 = vmul.f32 %v139_v22, %v135_v24 }
 0x126   :  { %v144_v26 = vadd.f32 %v142_v9, %v141_v25 }
 0x128   :  { %774 = vmatmul.msk.f32.gmra.mxu0 %vm46_vm0, %v144_v26 }
 0x19d   :  { %v169_v27 = vpop.f32.mrf.mxu0 }
 0x19e   :  { %v989_v32 = vadd.f32 %v815_v28, %v169_v27 }
 0x1a0   :  { %v187_v39 = vmul.f32 %v1000_v36, %v989_v32  ;;  %v189_v40 = vmul.f32 %v1002_v37, %v989_v32  ;;  %v191_v45 = vmul.f32 %v1018_v44, %v989_v32  ;;  %v193_v49 = vmul.f32 %v1026_v48, %v989_v32 }
 0x1a5   :  { %v172_v30 = vpop.f32.mrf.mxu0 }
 0x1a6   :  { %v987_v31 = vadd.f32 %v815_v28, %v172_v30 }
 0x1a8   :  { %199 = vrot.lane.b32.xlu2 %v987_v31, %s897_s30  ;;  %v810_v18 = vpack.i.bf16 %v989_v32, %v987_v31  ;;  %v188_v41 = vmul.f32 %v1000_v36, %v987_v31  ;;  %v190_v42 = vmul.f32 %v1002_v37, %v987_v31  ;;  %v192_v46 = vmul.f32 %v1018_v44, %v987_v31 }
 0x1a9   :  { %v194_v50 = vmul.f32 %v1026_v48, %v987_v31 }
 0x1b0   :  { %197 = vrot.lane.b32.xlu2 %v989_v32, %s897_s30 }
 0x202   :  { %v200_v34 = vpop.permute.xlu2 %199 }
 0x203   :  { %775 = vmatpush.xpose.msk.msrb.mxu0 %vm46_vm0, %v200_v34  ;;  %799 = vmatpush.xpose.msk.msra.mxu1 %vm46_vm0, %v200_v34 }
 0x20a   :  { %v198_v38 = vpop.permute.xlu2 %197 }
 0x20b   :  { %776 = vmatpush.xpose.msk.msrb.mxu0 %vm46_vm0, %v198_v38  ;;  %800 = vmatpush.xpose.msk.msra.mxu1 %vm46_vm0, %v198_v38 }
 0x20e   :  { %777 = vmatmul.msk.f32.vlgmr.msrb.gmra.mxu0 %vm46_vm0, %v187_v39  ;;  %779 = vmatmul.msk.f32.vlgmr.msra.gmra.mxu1 %vm46_vm0, %v189_v40 }
 0x216   :  { %778 = vmatmul.msk.f32.gmra.mxu0 %vm46_vm0, %v188_v41  ;;  %780 = vmatmul.msk.f32.gmra.mxu1 %vm46_vm0, %v190_v42 }
 0x21e   :  { %781 = vmatmul.msk.f32.gmra.mxu1 %vm46_vm0, %v191_v45 }
 0x226   :  { %782 = vmatmul.msk.f32.gmra.mxu1 %vm46_vm0, %v192_v46 }
 0x22e   :  { %783 = vmatmul.msk.f32.gmra.mxu1 %vm46_vm0, %v193_v49 }
 0x236   :  { %784 = vmatmul.msk.f32.gmra.mxu1 %vm46_vm0, %v194_v50 }
 0x28b   :  { %v246_v51 = vpop.f32.mrf.mxu0  ;;  %v252_v52 = vpop.f32.mrf.mxu1 }
 0x28c   :  { %v270_v54 = vmul.f32 0.35355338, %v246_v51  ;;  %v272_v55 = vmul.f32 0.35355338, %v252_v52 }
 0x28e   :  { %v280_v56 = vadd.f32 %v272_v55, %v44_v53  ;;  %v278_v57 = vadd.f32 %v270_v54, %v44_v53 }
 0x290   :  { %v293_v58 = vsel %vm286_vm15, %v280_v56, -inf  ;;  %v287_v60 = vsel %vm286_vm15, %v278_v57, -inf }
 0x291   :  { %294 = vmax.xlane.f32.xlu2 %v293_v58  ;;  %288 = vmax.xlane.f32.xlu0 %v287_v60 }
 0x293   :  { %v249_v61 = vpop.f32.mrf.mxu0  ;;  %v255_v62 = vpop.f32.mrf.mxu1 }
 0x294   :  { %v271_v1 = vmul.f32 0.35355338, %v249_v61  ;;  %v273_v3 = vmul.f32 0.35355338, %v255_v62 }
 0x296   :  { %v281_v4 = vadd.f32 %v273_v3, %v45_v63  ;;  %v279_v5 = vadd.f32 %v271_v1, %v45_v63 }
 0x298   :  { %v296_v6 = vsel %vm286_vm15, %v281_v4, -inf  ;;  %v290_v7 = vsel %vm286_vm15, %v279_v5, -inf }
 0x299   :  { %297 = vmax.xlane.f32.xlu0 %v296_v6  ;;  %291 = vmax.xlane.f32.xlu1 %v290_v7 }
 0x29b   :  { %v258_v8 = vpop.f32.mrf.mxu1 }
 0x29c   :  { %v274_v9 = vmul.f32 0.35355338, %v258_v8 }
 0x29e   :  { %v282_v11 = vadd.f32 %v274_v9, %v44_v53 }
 0x2a0   :  { %v299_v12 = vsel %vm286_vm15, %v282_v11, -inf }
 0x2a1   :  { %300 = vmax.xlane.f32.xlu1 %v299_v12 }
 0x2a3   :  { %v261_v14 = vpop.f32.mrf.mxu1 }
 0x2a4   :  { %v275_v15 = vmul.f32 0.35355338, %v261_v14 }
 0x2a6   :  { %v283_v16 = vadd.f32 %v275_v15, %v45_v63 }
 0x2a8   :  { %v302_v17 = vsel %vm286_vm15, %v283_v16, -inf }
 0x2a9   :  { %303 = vmax.xlane.f32.xlu0 %v302_v17 }
 0x2ab   :  { %v264_v19 = vpop.f32.mrf.mxu1 }
 0x2ac   :  { %v276_v20 = vmul.f32 0.35355338, %v264_v19 }
 0x2ae   :  { %v284_v21 = vadd.f32 %v276_v20, %v44_v53 }
 0x2b0   :  { %v305_v13 = vsel %vm286_vm15, %v284_v21, -inf }
 0x2b1   :  { %306 = vmax.xlane.f32.xlu1 %v305_v13 }
 0x2b3   :  { %v267_v22 = vpop.f32.mrf.mxu1 }
 0x2b4   :  { %v277_v23 = vmul.f32 0.35355338, %v267_v22 }
 0x2b6   :  { %v285_v24 = vadd.f32 %v277_v23, %v45_v63 }
 0x2b8   :  { %v308_v25 = vsel %vm286_vm15, %v285_v24, -inf }
 0x2b9   :  { %309 = vmax.xlane.f32.xlu1 %v308_v25 }
 0x304   :  { %v295_v26 = vpop.xlane.xlu2 %294  ;;  %v289_v27 = vpop.xlane.xlu0 %288 }
 0x305   :  { %v313_v28 = vsub.f32 %v280_v56, %v295_v26  ;;  %v311_v30 = vsub.f32 %v278_v57, %v289_v27 }
 0x307   :  { %v323_v33 = vmul.f32 1.442695, %v313_v28  ;;  %v319_v34 = vmul.f32 1.442695, %v311_v30 }
 0x309   :  { %829 = vpow2.f32 %v323_v33 }
 0x30a   :  { %831 = vpow2.f32 %v319_v34 }
 0x30c   :  { %v298_v35 = vpop.xlane.xlu0 %297  ;;  %v292_v38 = vpop.xlane.xlu1 %291 }
 0x30d   :  { %v314_v39 = vsub.f32 %v281_v4, %v298_v35  ;;  %v312_v40 = vsub.f32 %v279_v5, %v292_v38 }
 0x30f   :  { %v1048_v41 = vpop.eup %829  ;;  %v325_v42 = vmul.f32 1.442695, %v314_v39  ;;  %v321_v43 = vmul.f32 1.442695, %v312_v40 }
 0x310   :  { %v1050_v45 = vpop.eup %831  ;;  %v341_v46 = vsel %vm286_vm15, %v1048_v41, 0.0 }
 0x311   :  { %833 = vpow2.f32 %v325_v42  ;;  %v335_v47 = vsel %vm286_vm15, %v1050_v45, 0.0  ;;  %342 = vadd.xlane.f32.xlu1 %v341_v46 }
 0x312   :  { %835 = vpow2.f32 %v321_v43  ;;  %336 = vadd.xlane.f32.xlu0 %v335_v47 }
 0x314   :  { %v301_v49 = vpop.xlane.xlu1 %300 }
 0x315   :  { %v315_v50 = vsub.f32 %v282_v11, %v301_v49 }
 0x317   :  { %v1056_v51 = vpop.eup %833  ;;  %v327_v52 = vmul.f32 1.442695, %v315_v50 }
 0x318   :  { %v1058_v53 = vpop.eup %835  ;;  %v344_v54 = vsel %vm286_vm15, %v1056_v51, 0.0 }
 0x319   :  { %837 = vpow2.f32 %v327_v52  ;;  %345 = vadd.xlane.f32.xlu1 %v344_v54  ;;  %v338_v55 = vsel %vm286_vm15, %v1058_v53, 0.0 }
 0x31a   :  { %339 = vadd.xlane.f32.xlu0 %v338_v55 }
 0x31c   :  { %v304_v56 = vpop.xlane.xlu0 %303 }
 0x31d   :  { %v316_v57 = vsub.f32 %v283_v16, %v304_v56 }
 0x31f   :  { %v1064_v58 = vpop.eup %837  ;;  %v329_v60 = vmul.f32 1.442695, %v316_v57 }
 0x320   :  { %v347_v61 = vsel %vm286_vm15, %v1064_v58, 0.0 }
 0x321   :  { %839 = vpow2.f32 %v329_v60  ;;  %348 = vadd.xlane.f32.xlu2 %v347_v61 }
 0x324   :  { %v307_v62 = vpop.xlane.xlu1 %306 }
 0x325   :  { %v317_v63 = vsub.f32 %v284_v21, %v307_v62 }
 0x327   :  { %v1068_v1 = vpop.eup %839  ;;  %v331_v3 = vmul.f32 1.442695, %v317_v63 }
 0x328   :  { %v350_v4 = vsel %vm286_vm15, %v1068_v1, 0.0 }
 0x329   :  { %841 = vpow2.f32 %v331_v3  ;;  %351 = vadd.xlane.f32.xlu1 %v350_v4 }
 0x32c   :  { %v310_v5 = vpop.xlane.xlu1 %309 }
 0x32d   :  { %v318_v6 = vsub.f32 %v285_v24, %v310_v5 }
 0x32e   :  { %811 = vrot.lane.b32.xlu0 %v810_v18, %s898_s10 }
 0x32f   :  { %v1075_v7 = vpop.eup %841  ;;  %v333_v8 = vmul.f32 1.442695, %v318_v6 }
 0x330   :  { %v353_v9 = vsel %vm286_vm15, %v1075_v7, 0.0 }
 0x331   :  { %843 = vpow2.f32 %v333_v8  ;;  %354 = vadd.xlane.f32.xlu2 %v353_v9 }
 0x337   :  { %v1079_v11 = vpop.eup %843 }
 0x338   :  { %v356_v12 = vsel %vm286_vm15, %v1079_v11, 0.0 }
 0x339   :  { %357 = vadd.xlane.f32.xlu1 %v356_v12 }
 0x384   :  { %v1083_v32 = vpop.xlane.xlu1 %342 }
 0x385   :  { %v337_v14 = vpop.xlane.xlu0 %336  ;;  %v400_v62 = vand.u32 2147483648, %v1083_v32  ;;  %vm394_vm10 = vweird.f32 %v1083_v32  ;;  %v398_v4 = vand.u32 2147483647, %v1083_v32 }
 0x386   :  { %845 = vrcp.f32 %v337_v14  ;;  %v370_v24 = vand.u32 2147483648, %v337_v14  ;;  %vm364_vm2 = vweird.f32 %v337_v14  ;;  %v368_v25 = vand.u32 2147483647, %v337_v14 }
 0x387   :  { %v401_v9 = vor.u32 1.1754944e-38, %v400_v62  ;;  %vm399_vm12 = vcmp.eq.f32.partialorder %v398_v4, 8.507059e+37 }
 0x388   :  { %v371_v30 = vor.u32 1.1754944e-38, %v370_v24  ;;  %vm369_vm4 = vcmp.eq.f32.partialorder %v368_v25, 8.507059e+37 }
 0x38c   :  { %v846_v15 = vpop.eup %845  ;;  %v1086_v13 = vpop.xlane.xlu1 %345 }
 0x38d   :  { %v340_v16 = vpop.xlane.xlu0 %339  ;;  %v360_v31 = vmul.f32 %v846_v15, %v337_v14  ;;  %vm365_vm1 = vweird.f32 %v846_v15  ;;  %vm409_vm14 = vweird.f32 %v1086_v13 }
 0x38e   :  { %847 = vrcp.f32 %v340_v16  ;;  %vm366_vm3 = vmor %vm364_vm2, %vm365_vm1  ;;  %v385_v43 = vand.u32 2147483648, %v340_v16  ;;  %vm379_vm6 = vweird.f32 %v340_v16  ;;  %v383_v50 = vand.u32 2147483647, %v340_v16 }
 0x38f   :  { %v361_v18 = vsub.f32 1.0, %v360_v31  ;;  %849 = vrcp.f32 %v1083_v32 }
 0x390   :  { %851 = vrcp.f32 %v1086_v13  ;;  %v386_v56 = vor.u32 1.1754944e-38, %v385_v43  ;;  %vm384_vm8 = vcmp.eq.f32.partialorder %v383_v50, 8.507059e+37 }
 0x391   :  { %v362_v19 = vmul.f32 %v846_v15, %v361_v18 }
 0x393   :  { %v363_v22 = vadd.f32 %v846_v15, %v362_v19  ;;  %v413_v19 = vand.u32 2147483647, %v1086_v13 }
 0x394   :  { %v848_v17 = vpop.eup %847  ;;  %v1090_v39 = vpop.xlane.xlu2 %348 }
 0x395   :  { %v375_v20 = vmul.f32 %v848_v17, %v340_v16  ;;  %v850_v23 = vpop.eup %849  ;;  %v367_v28 = vsel %vm366_vm3, %v846_v15, %v363_v22  ;;  %vm380_vm5 = vweird.f32 %v848_v17  ;;  %853 = vrcp.f32 %v1090_v39 }
 0x396   :  { %v390_v26 = vmul.f32 %v850_v23, %v1083_v32  ;;  %v372_v35 = vsel %vm369_vm4, %v371_v30, %v367_v28  ;;  %v1092_v42 = vpop.eup %851  ;;  %vm381_vm7 = vmor %vm379_vm6, %vm380_vm5  ;;  %vm395_vm9 = vweird.f32 %v850_v23  ;;  %v415_v32 = vand.u32 2147483648, %v1086_v13 }
 0x397   :  { %v376_v21 = vsub.f32 1.0, %v375_v20  ;;  %v373_v49 = vmul.f32 %v1050_v45, %v372_v35  ;;  %v405_v54 = vmul.f32 %v1092_v42, %v1086_v13  ;;  %vm396_vm11 = vmor %vm394_vm10, %vm395_vm9  ;;  %vm410_vm13 = vweird.f32 %v1092_v42 }
 0x398   :  { %v391_v38 = vsub.f32 1.0, %v390_v26  ;;  %vm411_vm1 = vmor %vm409_vm14, %vm410_vm13  ;;  %v416_v24 = vor.u32 1.1754944e-38, %v415_v32  ;;  %vm414_vm2 = vcmp.eq.f32.partialorder %v413_v19, 8.507059e+37  ;;  %vm424_vm6 = vweird.f32 %v1090_v39 }
 0x399   :  { %v377_v27 = vmul.f32 %v848_v17, %v376_v21  ;;  %v406_v60 = vsub.f32 1.0, %v405_v54 }
 0x39a   :  { %v392_v52 = vmul.f32 %v850_v23, %v391_v38 }
 0x39b   :  { %v378_v40 = vadd.f32 %v848_v17, %v377_v27  ;;  %v1101_v45 = vpop.eup %853  ;;  %v407_v5 = vmul.f32 %v1092_v42, %v406_v60 }
 0x39c   :  { %v1094_v47 = vpop.xlane.xlu1 %351  ;;  %v393_v61 = vadd.f32 %v850_v23, %v392_v52  ;;  %v420_v6 = vmul.f32 %v1101_v45, %v1090_v39  ;;  %vm425_vm4 = vweird.f32 %v1101_v45 }
 0x39d   :  { %v382_v55 = vsel %vm381_vm7, %v848_v17, %v378_v40  ;;  %855 = vrcp.f32 %v1094_v47  ;;  %vm426_vm9 = vmor %vm424_vm6, %vm425_vm4 }
 0x39e   :  { %v387_v57 = vsel %vm384_vm8, %v386_v56, %v382_v55  ;;  %v397_v8 = vsel %vm396_vm11, %v850_v23, %v393_v61  ;;  %v421_v15 = vsub.f32 1.0, %v420_v6  ;;  %v445_v56 = vand.u32 2147483648, %v1094_v47 }
 0x39f   :  { %v388_v3 = vmul.f32 %v1058_v53, %v387_v57  ;;  %v402_v12 = vsel %vm399_vm12, %v401_v9, %v397_v8  ;;  %v408_v53 = vadd.f32 %v1092_v42, %v407_v5  ;;  %vm439_vm12 = vweird.f32 %v1094_v47 }
 0x3a0   :  { %v812_v33 = vpop.permute.xlu0 %811  ;;  %v403_v17 = vmul.f32 %v1048_v41, %v402_v12  ;;  %v422_v20 = vmul.f32 %v1101_v45, %v421_v15  ;;  %v32_v15 = vld [vmem:[%s1270_s3 + $0x10] sm:$0xff] }
 0x3a1   :  { %v813_v34 = vunpack.i.l.bf16 %v812_v33  ;;  %v814_v46 = vunpack.i.h.bf16 %v812_v33  ;;  %v412_v23 = vsel %vm411_vm1, %v1092_v42, %v408_v53  ;;  %v428_v42 = vand.u32 2147483647, %v1090_v39 }
 0x3a2   :  { %v417_v13 = vsel %vm414_vm2, %v416_v24, %v412_v23  ;;  %v423_v30 = vadd.f32 %v1101_v45, %v422_v20 }
 0x3a3   :  { %523 = vmatpush.msra.mxu2 %v813_v34  ;;  %801 = vmatpush.msra.mxu3 %v813_v34  ;;  %v1112_v14 = vpop.eup %855  ;;  %v430_v34 = vand.u32 2147483648, %v1090_v39  ;;  %v418_v38 = vmul.f32 %v1056_v51, %v417_v13  ;;  %vm429_vm10 = vcmp.eq.f32.partialorder %v428_v42, 8.507059e+37 }
 0x3a4   :  { %v1114_v16 = vpop.xlane.xlu2 %354  ;;  %v435_v21 = vmul.f32 %v1112_v14, %v1094_v47  ;;  %v427_v52 = vsel %vm426_vm9, %v1101_v45, %v423_v30  ;;  %vm440_vm11 = vweird.f32 %v1112_v14  ;;  %v446_v45 = vor.u32 1.1754944e-38, %v445_v56 }
 0x3a5   :  { %524 = vmatpush.msra.mxu2 %v814_v46  ;;  %802 = vmatpush.msra.mxu3 %v814_v46  ;;  %v431_v54 = vor.u32 1.1754944e-38, %v430_v34  ;;  %vm441_vm13 = vmor %vm439_vm12, %vm440_vm11  ;;  %vm454_vm2 = vweird.f32 %v1114_v16 }
 0x3a6   :  { %785 = vmatmul.msk.f32.vlgmr.msra.gmra.mxu2 %vm286_vm15, %v373_v49  ;;  %v436_v27 = vsub.f32 1.0, %v435_v21 }
 0x3a7   :  { %v432_v51 = vsel %vm429_vm10, %v431_v54, %v427_v52 }
 0x3a8   :  { %v437_v46 = vmul.f32 %v1112_v14, %v436_v27  ;;  %v433_v57 = vmul.f32 %v1064_v58, %v432_v51  ;;  %v458_v58 = vand.u32 2147483647, %v1114_v16 }
 0x3aa   :  { %v438_v55 = vadd.f32 %v1112_v14, %v437_v46  ;;  %vm459_vm4 = vcmp.eq.f32.partialorder %v458_v58, 8.507059e+37  ;;  %v25_v58 = vld [vmem:[%s1269_s2] sm:$0xff] }
 0x3ac   :  { %v358_v63 = vpop.xlane.xlu1 %357  ;;  %v442_v61 = vsel %vm441_vm13, %v1112_v14, %v438_v55  ;;  %v33_v14 = vld [vmem:[%s1270_s3 + $0x18] sm:$0xff] }
 0x3ad   :  { %857 = vrcp.f32 %v358_v63  ;;  %v475_v25 = vand.u32 2147483648, %v358_v63  ;;  %v473_v41 = vand.u32 2147483647, %v358_v63  ;;  %vm469_vm5 = vweird.f32 %v358_v63  ;;  %591 = vmatpush.msrb.mxu3 %v33_v14 }
 0x3ae   :  { %786 = vmatmul.msk.f32.gmra.mxu2 %vm286_vm15, %v388_v3  ;;  %859 = vrcp.f32 %v1114_v16  ;;  %v460_v3 = vand.u32 2147483648, %v1114_v16 }
 0x3af   :  { %v476_v35 = vor.u32 1.1754944e-38, %v475_v25  ;;  %vm474_vm8 = vcmp.eq.f32.partialorder %v473_v41, 8.507059e+37  ;;  %592 = vmatpush.msrb.mxu3 %v32_v15 }
 0x3b0   :  { %v461_v5 = vor.u32 1.1754944e-38, %v460_v3  ;;  %v27_v3 = vld [vmem:[%s1269_s2 + $0x10] sm:$0xff] }
 0x3b3   :  { %v858_v31 = vpop.eup %857 }
 0x3b4   :  { %v465_v18 = vmul.f32 %v858_v31, %v358_v63  ;;  %vm470_vm3 = vweird.f32 %v858_v31  ;;  %v860_v33 = vpop.eup %859 }
 0x3b5   :  { %vm471_vm7 = vmor %vm469_vm5, %vm470_vm3  ;;  %v450_v49 = vmul.f32 %v860_v33, %v1114_v16  ;;  %vm455_vm1 = vweird.f32 %v860_v33  ;;  %v31_v16 = vld [vmem:[%s1270_s3 + $0x8] sm:$0xff] }
 0x3b6   :  { %v466_v22 = vsub.f32 1.0, %v465_v18  ;;  %787 = vmatmul.msk.f32.gmra.mxu2 %vm286_vm15, %v403_v17  ;;  %vm456_vm3 = vmor %vm454_vm2, %vm455_vm1  ;;  %593 = vmatpush.msrb.mxu3 %v31_v16  ;;  %vm721_vm2 = vcmask 523264  }
 0x3b7   :  { %v451_v39 = vsub.f32 1.0, %v450_v49 }
 0x3b8   :  { %v467_v26 = vmul.f32 %v858_v31, %v466_v22 }
 0x3b9   :  { %v452_v60 = vmul.f32 %v860_v33, %v451_v39 }
 0x3ba   :  { %v468_v28 = vadd.f32 %v858_v31, %v467_v26 }
 0x3bb   :  { %v453_v63 = vadd.f32 %v860_v33, %v452_v60 }
 0x3bc   :  { %v472_v40 = vsel %vm471_vm7, %v858_v31, %v468_v28 }
 0x3bd   :  { %v477_v43 = vsel %vm474_vm8, %v476_v35, %v472_v40 }
 0x3be   :  { %788 = vmatmul.msk.f32.gmra.mxu2 %vm286_vm15, %v418_v38  ;;  %v478_v50 = vmul.f32 %v1079_v11, %v477_v43  ;;  %v443_v11 = vand.u32 2147483647, %v1094_v47  ;;  %v457_v47 = vsel %vm456_vm3, %v860_v33, %v453_v63  ;;  %v572_v43 = vperm.slane %v976_v59, 0  ;;  %v28_v63 = vld [vmem:[%s1269_s2 + $0x18] sm:$0xff] }
 0x3bf   :  { %v462_v6 = vsel %vm459_vm4, %v461_v5, %v457_v47  ;;  %707 = vmatpush.msra.mxu0 %v28_v63 }
 0x3c0   :  { %792 = vmatmul.msk.f32.vlgmr.msra.gmra.mxu3 %vm286_vm15, %v478_v50  ;;  %vm444_vm14 = vcmp.eq.f32.partialorder %v443_v11, 8.507059e+37  ;;  %v463_v8 = vmul.f32 %v1075_v7, %v462_v6  ;;  %v30_v7 = vld [vmem:[%s1270_s3] sm:$0xff] }
 0x3c1   :  { %v447_v62 = vsel %vm444_vm14, %v446_v45, %v442_v61  ;;  %594 = vmatpush.msrb.mxu3 %v30_v7  ;;  %708 = vmatpush.msra.mxu0 %v27_v3 }
 0x3c2   :  { %v448_v4 = vmul.f32 %v1068_v1, %v447_v62 }
 0x3c6   :  { %789 = vmatmul.msk.f32.gmra.mxu2 %vm286_vm15, %v433_v57 }
 0x3ce   :  { %790 = vmatmul.msk.f32.gmra.mxu2 %vm286_vm15, %v448_v4 }
 0x3d6   :  { %791 = vmatmul.msk.f32.gmra.mxu2 %vm286_vm15, %v463_v8 }
 0x429   :  { %v526_v9 = vpop.f32.mrf.mxu2 }
 0x42a   :  { %v550_v17 = vmul.f32 %v526_v9, %v1000_v36 }
 0x42c   :  { %v558_v21 = vsel %vm46_vm0, %v550_v17, 0.0 }
 0x431   :  { %v529_v12 = vpop.f32.mrf.mxu2 }
 0x432   :  { %v551_v26 = vmul.f32 %v529_v12, %v1000_v36 }
 0x434   :  { %v565_v35 = vsel %vm46_vm0, %v551_v26, 0.0 }
 0x439   :  { %v532_v1 = vpop.f32.mrf.mxu2 }
 0x43a   :  { %v552_v18 = vmul.f32 %v532_v1, %v1002_v37 }
 0x43c   :  { %v559_v20 = vsel %vm46_vm0, %v552_v18, 0.0 }
 0x43d   :  { %v560_v24 = vadd.f32 %v559_v20, %v558_v21  ;;  %v40_v20 = vld [vmem:[%s1270_s3 + $0x50] sm:$0xff] }
 0x441   :  { %v535_v53 = vpop.f32.mrf.mxu2 }
 0x442   :  { %v553_v22 = vmul.f32 %v535_v53, %v1002_v37 }
 0x443   :  { %v547_v33 = vpop.f32.mrf.mxu3 }
 0x444   :  { %v566_v28 = vsel %vm46_vm0, %v553_v22, 0.0  ;;  %v557_v36 = vmul.f32 %v547_v33, %v1026_v48 }
 0x445   :  { %v567_v38 = vadd.f32 %v566_v28, %v565_v35 }
 0x449   :  { %v538_v31 = vpop.f32.mrf.mxu2 }
 0x44a   :  { %v554_v19 = vmul.f32 %v538_v31, %v1018_v44 }
 0x44c   :  { %v561_v23 = vsel %vm46_vm0, %v554_v19, 0.0 }
 0x44d   :  { %v562_v27 = vadd.f32 %v561_v23, %v560_v24  ;;  %v39_v23 = vld [vmem:[%s1270_s3 + $0x48] sm:$0xff] }
 0x451   :  { %v541_v32 = vpop.f32.mrf.mxu2 }
 0x452   :  { %v555_v41 = vmul.f32 %v541_v32, %v1018_v44  ;;  %v570_v44 = vsel %vm46_vm0, %v557_v36, 0.0 }
 0x454   :  { %v568_v37 = vsel %vm46_vm0, %v555_v41, 0.0 }
 0x455   :  { %v569_v40 = vadd.f32 %v568_v37, %v567_v38  ;;  %v680_v37 = vperm.slane %v976_v59, 4 }
 0x457   :  { %v571_v42 = vadd.f32 %v570_v44, %v569_v40 }
 0x459   :  { %v544_v25 = vpop.f32.mrf.mxu2 }
 0x45a   :  { %v556_v13 = vmul.f32 %v544_v25, %v1026_v48  ;;  %v38_v25 = vld [vmem:[%s1270_s3 + $0x40] sm:$0xff] }
 0x45c   :  { %v563_v30 = vsel %vm46_vm0, %v556_v13, 0.0  ;;  %v37_v13 = vld [vmem:[%s1270_s3 + $0x38] sm:$0xff] }
 0x45d   :  { %v564_v34 = vadd.f32 %v563_v30, %v562_v27 }
 0x45f   :  { %793 = vmatmul.msk.f32.vlgmr.msrb.gmra.mxu3 %vm46_vm0, %v564_v34 }
 0x467   :  { %794 = vmatmul.msk.f32.gmra.mxu3 %vm46_vm0, %v571_v42 }
 0x4e2   :  { %v596_v46 = vpop.f32.mrf.mxu3 }
 0x4e3   :  { %v597_v49 = vadd.f32 %v596_v46, %v572_v43 }
 0x4e5   :  { %v1189_v50 = vadd.f32 %v597_v49, %v930_v0 }
 0x4e7   :  { %v604_v52 = vsel %vm46_vm0, %v1189_v50, 0.0 }
 0x4e8   :  { %605 = vadd.xlane.f32.xlu2 %v604_v52  ;;  %v685_v52 = vperm.slane %v976_v59, 5 }
 0x4ea   :  { %v599_v54 = vpop.f32.mrf.mxu3 }
 0x4eb   :  { %v600_v51 = vadd.f32 %v599_v54, %v572_v43 }
 0x4ed   :  { %v1194_v48 = vadd.f32 %v600_v51, %v937_v2 }
 0x4ef   :  { %v607_v39 = vsel %vm46_vm0, %v1194_v48, 0.0 }
 0x4f0   :  { %608 = vadd.xlane.f32.xlu0 %v607_v39 }
 0x55b   :  { %v606_v55 = vpop.xlane.xlu2 %605 }
 0x55c   :  { %v610_v56 = vmul.f32 %v606_v55, %v941_v10 }
 0x55e   :  { %v1200_v57 = vsub.f32 %v1189_v50, %v610_v56 }
 0x560   :  { %v614_v0 = vmul.f32 %v1200_v57, %v1200_v57  ;;  %v681_v43 = vmul.f32 %v680_v37, %v1200_v57 }
 0x562   :  { %v616_v11 = vsel %vm46_vm0, %v614_v0, 0.0 }
 0x563   :  { %617 = vadd.xlane.f32.xlu1 %v616_v11  ;;  %v609_v60 = vpop.xlane.xlu0 %608 }
 0x564   :  { %v611_v2 = vmul.f32 %v609_v60, %v941_v10  ;;  %v26_v10 = vld [vmem:[%s1269_s2 + $0x8] sm:$0xff] }
 0x565   :  { %709 = vmatpush.msra.mxu0 %v26_v10 }
 0x566   :  { %v1207_v61 = vsub.f32 %v1194_v48, %v611_v2 }
 0x567   :  { %710 = vmatpush.msra.mxu0 %v25_v58  ;;  %v35_v58 = vld [vmem:[%s1270_s3 + $0x28] sm:$0xff] }
 0x568   :  { %v615_v45 = vmul.f32 %v1207_v61, %v1207_v61 }
 0x56a   :  { %v619_v62 = vsel %vm46_vm0, %v615_v45, 0.0  ;;  %v682_v45 = vmul.f32 %v680_v37, %v1207_v61  ;;  %v34_v61 = vld [vmem:[%s1270_s3 + $0x20] sm:$0xff] }
 0x56b   :  { %620 = vadd.xlane.f32.xlu2 %v619_v62 }
 0x5d6   :  { %v618_v4 = vpop.xlane.xlu1 %617 }
 0x5d7   :  { %v622_v47 = vmul.f32 %v618_v4, %v963_v29  ;;  %v36_v4 = vld [vmem:[%s1270_s3 + $0x30] sm:$0xff] }
 0x5d9   :  { %861 = vrsqrt.f32 %v622_v47  ;;  %vm631_vm15 = vcmp.eq.f32.partialorder %v622_v47, inf  ;;  %v634_v32 = vand.u32 2147483648, %v622_v47  ;;  %vm633_vm5 = vcmp.eq.f32.partialorder %v622_v47, 0.0 }
 0x5de   :  { %v621_v5 = vpop.xlane.xlu2 %620 }
 0x5df   :  { %v862_v6 = vpop.eup %861  ;;  %v623_v8 = vmul.f32 %v621_v5, %v963_v29  ;;  %v41_v29 = vld [vmem:[%s1270_s3 + $0x58] sm:$0xff]  ;;  %s899_s3 = smov [#allocation2]  }
 0x5e0   :  { %v625_v9 = vmul.f32 %v862_v6, %v622_v47  ;;  %736 = vmatpush.msra.mxu3 %v41_v29  ;;  %s759_s17 = sshll.u32 %s899_s3, 4  ;;  %s760_s17 = int_to_ptr.vmem [resolvable:$true] %s759_s17 }
 0x5e1   :  { %863 = vrsqrt.f32 %v623_v8  ;;  %vm643_vm6 = vcmp.eq.f32.partialorder %v623_v8, inf  ;;  %v646_v41 = vand.u32 2147483648, %v623_v8  ;;  %vm645_vm7 = vcmp.eq.f32.partialorder %v623_v8, 0.0 }
 0x5e2   :  { %v626_v12 = vmul.f32 %v862_v6, %v625_v9  ;;  %737 = vmatpush.msra.mxu3 %v40_v20 }
 0x5e4   :  { %v627_v14 = vmul.f32 0.5, %v626_v12  ;;  %738 = vmatpush.msra.mxu3 %v39_v23 }
 0x5e6   :  { %v628_v1 = vsub.f32 1.5, %v627_v14  ;;  %739 = vmatpush.msra.mxu3 %v38_v25 }
 0x5e7   :  { %v864_v15 = vpop.eup %863 }
 0x5e8   :  { %v629_v16 = vmul.f32 %v862_v6, %v628_v1  ;;  %v637_v7 = vmul.f32 %v864_v15, %v623_v8  ;;  %740 = vmatpush.msra.mxu3 %v37_v13  ;;  %v720_v1 = vperm.slane %v976_v59, 1 }
 0x5ea   :  { %v630_v53 = vmul.f32 %v629_v16, %v622_v47  ;;  %v638_v31 = vmul.f32 %v864_v15, %v637_v7  ;;  %741 = vmatpush.msra.mxu3 %v36_v4 }
 0x5ec   :  { %v632_v18 = vsel %vm631_vm15, %v622_v47, %v630_v53  ;;  %v639_v17 = vmul.f32 0.5, %v638_v31  ;;  %742 = vmatpush.msra.mxu3 %v35_v58  ;;  %v816_v47 = vld [vmem:[%s1269_s2 + $0x20] ss:$0 sm:$0xff] }
 0x5ed   :  { %v635_v19 = vsel %vm633_vm5, %v634_v32, %v632_v18 }
 0x5ee   :  { %v648_v21 = vadd.f32 1e-06, %v635_v19  ;;  %v640_v22 = vsub.f32 1.5, %v639_v17  ;;  %743 = vmatpush.msra.mxu3 %v34_v61 }
 0x5f0   :  { %865 = vrcp.f32 %v648_v21  ;;  %v641_v24 = vmul.f32 %v864_v15, %v640_v22  ;;  %v661_v38 = vand.u32 2147483648, %v648_v21  ;;  %v659_v40 = vand.u32 2147483647, %v648_v21 }
 0x5f1   :  { %vm655_vm9 = vweird.f32 %v648_v21 }
 0x5f2   :  { %v642_v26 = vmul.f32 %v641_v24, %v623_v8  ;;  %v662_v46 = vor.u32 1.1754944e-38, %v661_v38  ;;  %vm660_vm11 = vcmp.eq.f32.partialorder %v659_v40, 8.507059e+37 }
 0x5f4   :  { %v644_v27 = vsel %vm643_vm6, %v623_v8, %v642_v26 }
 0x5f5   :  { %v647_v28 = vsel %vm645_vm7, %v646_v41, %v644_v27 }
 0x5f6   :  { %v866_v30 = vpop.eup %865  ;;  %v649_v33 = vadd.f32 1e-06, %v647_v28 }
 0x5f7   :  { %v651_v34 = vmul.f32 %v866_v30, %v648_v21  ;;  %vm656_vm8 = vweird.f32 %v866_v30 }
 0x5f8   :  { %867 = vrcp.f32 %v649_v33  ;;  %vm657_vm10 = vmor %vm655_vm9, %vm656_vm8  ;;  %v676_v56 = vand.u32 2147483648, %v649_v33  ;;  %v674_v60 = vand.u32 2147483647, %v649_v33  ;;  %vm670_vm13 = vweird.f32 %v649_v33 }
 0x5f9   :  { %v652_v35 = vsub.f32 1.0, %v651_v34 }
 0x5fa   :  { %v677_v57 = vor.u32 1.1754944e-38, %v676_v56  ;;  %vm675_vm1 = vcmp.eq.f32.partialorder %v674_v60, 8.507059e+37 }
 0x5fb   :  { %v653_v36 = vmul.f32 %v866_v30, %v652_v35 }
 0x5fd   :  { %v654_v44 = vadd.f32 %v866_v30, %v653_v36 }
 0x5fe   :  { %v868_v42 = vpop.eup %867 }
 0x5ff   :  { %v658_v49 = vsel %vm657_vm10, %v866_v30, %v654_v44  ;;  %v666_v54 = vmul.f32 %v868_v42, %v649_v33  ;;  %vm671_vm12 = vweird.f32 %v868_v42 }
 0x600   :  { %v663_v51 = vsel %vm660_vm11, %v662_v46, %v658_v49  ;;  %vm672_vm14 = vmor %vm670_vm13, %vm671_vm12 }
 0x601   :  { %v683_v39 = vmul.f32 %v681_v43, %v663_v51  ;;  %v667_v55 = vsub.f32 1.0, %v666_v54 }
 0x603   :  { %v686_v0 = vadd.f32 %v685_v52, %v683_v39  ;;  %v668_v11 = vmul.f32 %v868_v42, %v667_v55 }
 0x605   :  { %795 = vmatmul.msk.f32.vlgmr.msra.gmra.mxu0 %vm46_vm0, %v686_v0  ;;  %v669_v2 = vadd.f32 %v868_v42, %v668_v11 }
 0x607   :  { %v673_v62 = vsel %vm672_vm14, %v868_v42, %v669_v2 }
 0x608   :  { %v678_v63 = vsel %vm675_vm1, %v677_v57, %v673_v62 }
 0x609   :  { %v684_v3 = vmul.f32 %v682_v45, %v678_v63 }
 0x60b   :  { %v687_v10 = vadd.f32 %v685_v52, %v684_v3 }
 0x60d   :  { %796 = vmatmul.msk.f32.gmra.mxu0 %vm46_vm0, %v687_v10 }
 0x682   :  { %v712_v5 = vpop.f32.mrf.mxu0 }
 0x683   :  { %v713_v6 = vadd.f32 %v816_v47, %v712_v5 }
 0x685   :  { %v718_v8 = vmax.f32 %v713_v6, 0.0 }
 0x687   :  { %797 = vmatmul.msk.f32.vlgmr.msra.gmra.mxu3 %vm721_vm2, %v718_v8 }
 0x68a   :  { %v715_v9 = vpop.f32.mrf.mxu0 }
 0x68b   :  { %v716_v12 = vadd.f32 %v816_v47, %v715_v9 }
 0x68d   :  { %v719_v14 = vmax.f32 %v716_v12, 0.0 }
 0x68f   :  { %798 = vmatmul.msk.f32.gmra.mxu3 %vm721_vm2, %v719_v14 }
 0x70a   :  { %v745_v15 = vpop.f32.mrf.mxu3 }
 0x70b   :  { %v746_v16 = vadd.f32 %v745_v15, %v720_v1 }
 0x70d   :  { %v751_v7 = vadd.f32 %v746_v16, %v1189_v50 }
 0x70f   :  { %753 = vst.msk [vmem:[#allocation2] sm:$0xff] %vm46_vm0, %v751_v7 }
 0x712   :  { %v748_v53 = vpop.f32.mrf.mxu3 }
 0x713   :  { %v749_v31 = vadd.f32 %v748_v53, %v720_v1 }
 0x715   :  { %v752_v32 = vadd.f32 %v749_v31, %v1194_v48 }
 0x717   :  { %754 = vst.msk [vmem:[#allocation2 + $0x8] sm:$0xff] %vm46_vm0, %v752_v32 }
 0x718   :  { %767 = dma.vmem_to_hbm [thread:$0]  %s760_s17, 256, %s762_s0, [#allocation3], %s900_s19, %s900_s19, %s901_s20  }
 0x719   :  { %893 = dma.done.wait [#allocation3], 256  }
 0x71a   :  { %894 = vsyncadd [#allocation3], 4294967040 }
 0x71b   :  { %772 = vsyncpa [#allocation3], 1 }

</bundles_post_ra>
